<compile_context>
chip_gen: v7x
topology: tpu7x:2x2x1
jax: 0.10.0
libtpu: 0.0.40
codegen_flags: <defaults>
</compile_context>

<pallas_src>
import jax
import jax.numpy as jnp
from jax.experimental import pallas as pl
from jax.experimental.pallas import tpu as pltpu


def _round_up(v, m):
    return (v + m - 1) // m * m


def _fused_linear_kernel(x_ref, w_ref, b_ref, out_ref):
    """out = cast(x) @ w + b  (f32 accumulation, lane-dense store).

    x_ref:   (TILE_N, D)       activation tile in the producer dtype (f32 here); cast
                               to the weight dtype in-register -> no extra HBM pass.
    w_ref:   (D, OUT_PAD)      fused [cls | bbox] bf16 weights; constant index_map so
                               the DMA is issued once and the block stays resident.
    b_ref:   (1, OUT_PAD)      fused bias (f32).
    out_ref: (TILE_N, OUT_PAD) 128-lane-padded fused output tile.
    """
    x = x_ref[...].astype(w_ref.dtype)          # in-kernel cast (VPU, hidden under MXU)
    acc = jnp.dot(x, w_ref[...], preferred_element_type=jnp.float32)
    out_ref[...] = (acc + b_ref[...]).astype(out_ref.dtype)


def prepare_fast_rcnn_params(w_cls, b_cls, w_bbox, b_bbox,
                             compute_dtype=jnp.bfloat16):
    """One-time weight prep (hoisted out of the per-call path).

    Args:
      w_cls:  (K+1, D)   PyTorch-layout Linear weight for cls_score.
      b_cls:  (K+1,)
      w_bbox: (R*B, D)   PyTorch-layout Linear weight for bbox_pred.
      b_bbox: (R*B,)

    Returns:
      w_fused: (D, OUT_PAD)  transposed + concatenated + lane-padded + cast
      b_fused: (1, OUT_PAD)  f32, zero-padded
      c_cls, c_box:          original output widths (for slicing)
    """
    c_cls, d = w_cls.shape
    c_box, d2 = w_bbox.shape
    assert d == d2
    out_total = c_cls + c_box
    out_pad = _round_up(out_total, 128)

    w_fused = jnp.concatenate([jnp.transpose(w_cls), jnp.transpose(w_bbox)], axis=1)
    w_fused = jnp.pad(w_fused, ((0, 0), (0, out_pad - out_total))).astype(compute_dtype)

    b_fused = jnp.concatenate([b_cls, b_bbox], axis=0)
    b_fused = jnp.pad(b_fused, (0, out_pad - out_total)).astype(jnp.float32)
    b_fused = b_fused.reshape(1, out_pad)
    return w_fused, b_fused, c_cls, c_box


def _select_tile_rows(n, tile_n, d, out_pad, x_itemsize, out_itemsize,
                      w_resident_bytes, vmem_budget=28 * 2**20):
    """Pick the proposal-tile height.

    Small N: a single block covering the whole array (legal regardless of alignment
    because block == full array; no padding, no wasted rows).
    Large N: a multiple of 256 (MXU/sublane friendly on v5e/v6e/v7x), capped so the
    grid has >= 2 steps (lets the "parallel" axis shard tiles across v7x's two TCs),
    and shrunk until double-buffered activation + output tiles plus the resident
    weights fit the conservative scoped-VMEM budget (v7x default scoped = 32 MiB).
    """
    def footprint(tile):
        return (2 * tile * d * x_itemsize            # activation tile, double-buffered
                + 2 * tile * out_pad * out_itemsize  # output tile, double-buffered
                + w_resident_bytes)                  # fused weights + bias, resident

    if n <= tile_n:
        return n
    tile = min(_round_up(tile_n, 256), _round_up(pl.cdiv(n, 2), 256))
    while tile > 128 and footprint(tile) > vmem_budget:
        tile //= 2
    return min(tile, n)


def fast_rcnn_output_layers_forward(x, w_fused, b_fused, c_cls, c_box, *,
                                    out_dtype=jnp.float32, tile_n=512):
    """Forward pass of FastRCNNOutputLayers using the fused Pallas kernel.

    Args:
      x: (N, C, H, W) or (N, D) RoI features (any float dtype; cast happens in-kernel).
      w_fused / b_fused / c_cls / c_box: outputs of prepare_fast_rcnn_params.

    Returns:
      (scores (N, c_cls), proposal_deltas (N, c_box))
    """
    # torch.flatten(x, start_dim=1). Emitting features already as (N, D) upstream makes
    # this a no-op instead of an NCHW relayout pass over HBM.
    if x.ndim > 2:
        x = x.reshape(x.shape[0], -1)
    n, d = x.shape
    d_w, out_pad = w_fused.shape
    assert d == d_w, f"feature dim {d} != prepared weight dim {d_w}"

    x_isz = jnp.dtype(x.dtype).itemsize
    o_isz = jnp.dtype(out_dtype).itemsize
    w_isz = jnp.dtype(w_fused.dtype).itemsize
    # Auto-pipelining still allocates 2 buffers for constant-index blocks (only one DMA
    # is issued); budget for both.
    # TODO(synk): pipeline_mode=pl.Buffered(1) on the weight/bias specs would drop the
    # idle second buffer (matters at realistic D ~ 12544, negligible at D = 1024).
    w_resident = 2 * (w_fused.size * w_isz + b_fused.size * 4)

    tile_rows = _select_tile_rows(n, tile_n, d, out_pad, x_isz, o_isz, w_resident)
    grid = (pl.cdiv(n, tile_rows),)

    needed = 2 * tile_rows * d * x_isz + 2 * tile_rows * out_pad * o_isz + w_resident
    vmem_limit = min(64 * 2**20, max(16 * 2**20, int(needed * 1.5) + (2 << 20)))

    flops = 2 * n * d * out_pad
    bytes_accessed = (n * d * x_isz
                      + w_fused.size * w_isz
                      + b_fused.size * 4
                      + n * out_pad * o_isz)

    fused_out = pl.pallas_call(
        _fused_linear_kernel,
        out_shape=jax.ShapeDtypeStruct((n, out_pad), out_dtype),
        grid_spec=pltpu.PrefetchScalarGridSpec(
            num_scalar_prefetch=0,
            grid=grid,
            in_specs=[
                # Activation tile: blocked along N, double-buffered behind the MXU.
                pl.BlockSpec((tile_rows, d), lambda i: (i, 0)),
                # Fused weights / bias: constant index_map -> one DMA, VMEM-resident.
                pl.BlockSpec((d, out_pad), lambda i: (0, 0)),
                pl.BlockSpec((1, out_pad), lambda i: (0, 0)),
            ],
            out_specs=pl.BlockSpec((tile_rows, out_pad), lambda i: (i, 0)),
        ),
        compiler_params=pltpu.CompilerParams(
            dimension_semantics=("parallel",),   # shard proposal tiles across TCs
            vmem_limit_bytes=vmem_limit),
        cost_estimate=pl.CostEstimate(
            flops=flops, transcendentals=0, bytes_accessed=bytes_accessed),
    )(x, w_fused, b_fused)

    scores = fused_out[:, :c_cls]
    deltas = fused_out[:, c_cls:c_cls + c_box]
    return scores, deltas


if __name__ == "__main__":
    # Module configuration (matches __init__ of FastRCNNOutputLayers):
    #   input_shape: channels=4, height=16, width=16  -> input_size D = 1024
    #   num_classes = 80, cls_agnostic_bbox_reg=False, box_dim = 4
    #   cls_score : Linear(1024, 81),  weight ~ N(0, 0.01^2),  bias = 0
    #   bbox_pred : Linear(1024, 320), weight ~ N(0, 0.001^2), bias = 0
    N, C, H, W = 8, 4, 16, 16
    num_classes = 80
    box_dim = 4
    num_bbox_reg_classes = num_classes       # cls_agnostic_bbox_reg = False
    D = C * H * W

    key = jax.random.PRNGKey(0)
    kx, kc, kb, kx2 = jax.random.split(key, 4)

    x = jax.random.normal(kx, (N, C, H, W), dtype=jnp.float32)
    w_cls = 0.01 * jax.random.normal(kc, (num_classes + 1, D), dtype=jnp.float32)
    b_cls = jnp.zeros((num_classes + 1,), dtype=jnp.float32)
    w_bbox = 0.001 * jax.random.normal(
        kb, (num_bbox_reg_classes * box_dim, D), dtype=jnp.float32)
    b_bbox = jnp.zeros((num_bbox_reg_classes * box_dim,), dtype=jnp.float32)

    # One-time (hoisted) weight prep, then the per-call forward.
    w_fused, b_fused, c_cls, c_box = prepare_fast_rcnn_params(
        w_cls, b_cls, w_bbox, b_bbox, compute_dtype=jnp.bfloat16)

    # --- Small-N (inference-typical) path: single block, grid = (1,) -------------
    scores, deltas = fast_rcnn_output_layers_forward(
        x, w_fused, b_fused, c_cls, c_box, out_dtype=jnp.float32)
    jax.block_until_ready((scores, deltas))

    assert scores.shape == (N, num_classes + 1)
    assert deltas.shape == (N, num_bbox_reg_classes * box_dim)

    def ref_fused(xf):
        # Same math outside Pallas: bf16 inputs, f32 accumulation.
        full = jnp.dot(xf.astype(jnp.bfloat16), w_fused,
                       preferred_element_type=jnp.float32) + b_fused
        return full[:, :c_cls], full[:, c_cls:c_cls + c_box]

    x_flat = x.reshape(N, -1)
    s_ref, d_ref = ref_fused(x_flat)
    assert jnp.allclose(scores, s_ref, atol=1e-3, rtol=1e-3)
    assert jnp.allclose(deltas, d_ref, atol=1e-3, rtol=1e-3)

    # Loose check: full-f32 PyTorch-equivalent math (bf16 cast costs ~0.4% rel).
    s_f32 = jnp.dot(x_flat, w_cls.T, precision=jax.lax.Precision.HIGHEST) + b_cls
    d_f32 = jnp.dot(x_flat, w_bbox.T, precision=jax.lax.Precision.HIGHEST) + b_bbox
    assert jnp.allclose(scores, s_f32, atol=3e-2, rtol=3e-2)
    assert jnp.allclose(deltas, d_f32, atol=3e-2, rtol=3e-2)

    # --- Large-N path: grid = (2,), "parallel" tiles, masked partial last block --
    N2 = 640
    x2 = jax.random.normal(kx2, (N2, D), dtype=jnp.float32)   # already (N, D) upstream
    s2, d2 = fast_rcnn_output_layers_forward(
        x2, w_fused, b_fused, c_cls, c_box, out_dtype=jnp.float32)
    jax.block_until_ready((s2, d2))
    assert s2.shape == (N2, num_classes + 1)
    assert d2.shape == (N2, num_bbox_reg_classes * box_dim)
    s2_ref, d2_ref = ref_fused(x2)
    assert jnp.allclose(s2, s2_ref, atol=1e-3, rtol=1e-3)
    assert jnp.allclose(d2, d2_ref, atol=1e-3, rtol=1e-3)

    print("KERNEL_OK")
</pallas_src>

<mosaic_0001>
module attributes {stable_mosaic.version = 11 : i64} {
  func.func @_fused_linear_kernel(%arg0: i32, %arg1: memref<8x1024xf32, #tpu.memory_space<vmem>>, %arg2: memref<1024x512xbf16, #tpu.memory_space<vmem>>, %arg3: memref<1x512xf32, #tpu.memory_space<vmem>>, %arg4: memref<8x512xf32, #tpu.memory_space<vmem>>) attributes {dimension_semantics = [#tpu.dimension_semantics<parallel>], iteration_bounds = array<i64: 1>, scalar_prefetch = 0 : i64, scratch_operands = 0 : i64, tpu.core_type = #tpu.core_type<tc>, window_params = [{transform_indices = @transform_0, window_bounds = array<i64: 8, 1024>}, {pipeline_mode = #tpu.pipeline_mode<synchronous>, transform_indices = @transform_1, window_bounds = array<i64: 1024, 512>}, {pipeline_mode = #tpu.pipeline_mode<synchronous>, transform_indices = @transform_2, window_bounds = array<i64: 1, 512>}, {transform_indices = @transform_3, window_bounds = array<i64: 8, 512>}]} {
    %c0 = arith.constant 0 : index
    %c0_0 = arith.constant 0 : index
    %0 = vector.load %arg1[%c0, %c0_0] : memref<8x1024xf32, #tpu.memory_space<vmem>>, vector<8x1024xf32>
    %1 = arith.truncf %0 : vector<8x1024xf32> to vector<8x1024xbf16>
    %c0_1 = arith.constant 0 : index
    %c0_2 = arith.constant 0 : index
    %2 = vector.load %arg2[%c0_1, %c0_2] : memref<1024x512xbf16, #tpu.memory_space<vmem>>, vector<1024x512xbf16>
    %cst = arith.constant dense<0.000000e+00> : vector<8x512xf32>
    %3 = tpu.matmul %1, %2, %cst {dimension_numbers = #tpu.dot_dimension_numbers<[1], [0], [0], [1], [0, 0, 1, 1], [], []>} : vector<8x1024xbf16>, vector<1024x512xbf16>, vector<8x512xf32> -> vector<8x512xf32>
    %c0_3 = arith.constant 0 : index
    %c0_4 = arith.constant 0 : index
    %4 = vector.load %arg3[%c0_3, %c0_4] : memref<1x512xf32, #tpu.memory_space<vmem>>, vector<1x512xf32>
    %5 = vector.broadcast %4 : vector<1x512xf32> to vector<8x512xf32>
    %6 = arith.addf %3, %5 : vector<8x512xf32>
    %c0_5 = arith.constant 0 : index
    %c0_6 = arith.constant 0 : index
    %7 = vector.load %arg4[%c0_5, %c0_6] : memref<8x512xf32, #tpu.memory_space<vmem>>, vector<8x512xf32>
    tpu.vector_store %arg4[%c0_5, %c0_6], %6 {strides = array<i32>} : memref<8x512xf32, #tpu.memory_space<vmem>>, vector<8x512xf32>,
    return
  }
  func.func @transform_0(%arg0: i32) -> (i32, i32) {
    %c0_i32 = arith.constant 0 : i32
    %c0_i32_0 = arith.constant 0 : i32
    return %arg0, %c0_i32 : i32, i32
  }
  func.func @transform_1(%arg0: i32) -> (i32, i32) {
    %c0_i32 = arith.constant 0 : i32
    %c0_i32_0 = arith.constant 0 : i32
    %c0_i32_1 = arith.constant 0 : i32
    return %c0_i32, %c0_i32_0 : i32, i32
  }
  func.func @transform_2(%arg0: i32) -> (i32, i32) {
    %c0_i32 = arith.constant 0 : i32
    %c0_i32_0 = arith.constant 0 : i32
    %c0_i32_1 = arith.constant 0 : i32
    return %c0_i32, %c0_i32_0 : i32, i32
  }
  func.func @transform_3(%arg0: i32) -> (i32, i32) {
    %c0_i32 = arith.constant 0 : i32
    %c0_i32_0 = arith.constant 0 : i32
    return %arg0, %c0_i32 : i32, i32
  }
}

</mosaic_0001>

<bundles_post_ra>
// kernel: tpu_custom_call.1
= control target key start
LH: loop header
LB: loop body
LE: loop exit
PB: predicated region body
PF: predicated region fallthrough
CT: control target
= control target key end

     0   :  { %8 = vsyncpa [#allocation3], 0  ;;  %s2779_s0 = inlined_call_operand.hbm [shape: f32[8,1024], index: 0, kind: input, shape index: {}]   ;;  %s2780_s1 = inlined_call_operand.hbm [shape: bf16[1024,512], index: 1, kind: input, shape index: {}]   ;;  %s2781_s2 = inlined_call_operand.vmem [shape: f32[1,512], index: 2, kind: input, shape index: {}]   ;;  %s2782_s3 = inlined_call_operand.hbm [shape: f32[8,512], index: 3, kind: output, shape index: {}]  }
   0x1   :  { %9 = vsyncpa [#allocation6], 0 }
   0x2   :  { %10 = vsyncpa [#allocation4], 0  ;;  %s2708_s12 = smov [#allocation2]   ;;  %s2709_s14 = smov [#allocation5]  }
   0x3   :  { %s17_s13 = sshll.u32 %s2708_s12, 4  ;;  %s26_s15 = sshll.u32 %s2709_s14, 4  ;;  %s18_s13 = int_to_ptr.vmem [resolvable:$true] %s17_s13  ;;  %s2733_s15 = int_to_ptr.vmem [resolvable:$true] %s26_s15 }
   0x4   :  { %s2636_s18 = scalar_lea.hbm %s2779_s0, 1024 }
   0x5   :  { %p2637_p0 = scmp.ne.s32.totalorder %s2779_s0, %s2636_s18  ;;  %p2640_p1 = scmp.lt.u32.totalorder %s2636_s18, %s2779_s0 }
   0x7   :  { %p2642_p2 = pnand %p2640_p1, %p2637_p0 }
   0x9   :  { %2645 = shalt.err (!%p2642_p2)
}
   0xa   :  { %s2646_s23 = scalar_lea.vmem %s18_s13, 1024  ;;  %p2651_p4 = scmp.lt.s32.totalorder %s18_s13, %s18_s13 }
   0xb   :  { %p2647_p3 = scmp.ne.s32.totalorder %s18_s13, %s2646_s23  ;;  %p2652_p5 = scmp.lt.s32.totalorder %s2646_s23, %s2646_s23 }
   0xd   :  { %p2653_p6 = por %p2652_p5, %p2651_p4 }
   0xf   :  { %p2654_p7 = pnand %p2653_p6, %p2647_p3 }
  0x11   :  { %2657 = shalt.err (!%p2654_p7)
}
  0x12   :  { %20 = dma.hbm_to_vmem [thread:$0]  %s2779_s0, 1024, %s18_s13, [#allocation3]  }
  0x13   :  { %s2658_s28 = scalar_lea.hbm %s2780_s1, 32768 }
  0x14   :  { %p2659_p8 = scmp.ne.s32.totalorder %s2780_s1, %s2658_s28  ;;  %p2662_p9 = scmp.lt.u32.totalorder %s2658_s28, %s2780_s1 }
  0x16   :  { %p2664_p10 = pnand %p2662_p9, %p2659_p8 }
  0x18   :  { %2667 = shalt.err (!%p2664_p10)
}
  0x19   :  { %s2668_s6 = scalar_lea.vmem %s2733_s15, 32768  ;;  %p2673_p12 = scmp.lt.s32.totalorder %s2733_s15, %s2733_s15 }
  0x1a   :  { %p2669_p11 = scmp.ne.s32.totalorder %s2733_s15, %s2668_s6  ;;  %p2674_p13 = scmp.lt.s32.totalorder %s2668_s6, %s2668_s6 }
  0x1c   :  { %p2675_p0 = por %p2674_p13, %p2673_p12 }
  0x1e   :  { %p2676_p1 = pnand %p2675_p0, %p2669_p11 }
  0x20   :  { %2679 = shalt.err (!%p2676_p1)
}
  0x21   :  { %s2710_s0 = smov 256   ;;  %s2711_s7 = smov 16  }
  0x22   :  { %32 = dma.hbm_to_vmem [thread:$0]  %s2780_s1, 32768, %s2733_s15, [#allocation6], %s2710_s0, %s2710_s0, %s2711_s7  }
  0x23   :  { %2702 = dma.done.wait [#allocation3], 1024  }
  0x24   :  { %2703 = vsyncadd [#allocation3], 4294966272 }
  0x25   :  { %2704 = dma.done.wait [#allocation6], 32768  }
  0x26   :  { %2705 = vsyncadd [#allocation6], 4294934528  ;;  %v2252_v0 = vld [vmem:[#allocation5 + $0x4] ss:$16 sps:$4 sm:$0xff]   ;;  %v2254_v1 = vld [vmem:[#allocation5 + $0xc] ss:$16 sps:$4 sm:$0xff]  }
  0x27   :  { %1615 = vmatprep.subr.bf16.mxu0 %v2252_v0  ;;  %v2256_v2 = vld [vmem:[#allocation5] ss:$16 sps:$4 sm:$0xff]   ;;  %v2257_v3 = vld [vmem:[#allocation5 + $0x8] ss:$16 sps:$4 sm:$0xff]   ;;  %1779 = vmatprep.subr.bf16.mxu1 %v2254_v1  ;;  %v2258_v4 = vld [vmem:[#allocation5 + $0x24] ss:$16 sps:$4 sm:$0xff]  }
  0x28   :  { %1616 = vmatpush1.bf16.msra.mxu0 %v2256_v2  ;;  %1780 = vmatpush1.bf16.msra.mxu1 %v2257_v3  ;;  %v2260_v5 = vld [vmem:[#allocation5 + $0x2c] ss:$16 sps:$4 sm:$0xff]   ;;  %v2262_v6 = vld [vmem:[#allocation5 + $0x20] ss:$16 sps:$4 sm:$0xff]   ;;  %v2263_v7 = vld [vmem:[#allocation5 + $0x28] ss:$16 sps:$4 sm:$0xff]  }
  0x29   :  { %1617 = vmatprep.subr.bf16.mxu0 %v2258_v4  ;;  %1781 = vmatprep.subr.bf16.mxu1 %v2260_v5  ;;  %v2264_v8 = vld [vmem:[#allocation5 + $0x44] ss:$16 sps:$4 sm:$0xff]   ;;  %v2266_v9 = vld [vmem:[#allocation5 + $0x4c] ss:$16 sps:$4 sm:$0xff]   ;;  %v2268_v10 = vld [vmem:[#allocation5 + $0x40] ss:$16 sps:$4 sm:$0xff]  }
  0x2a   :  { %v2269_v11 = vld [vmem:[#allocation5 + $0x48] ss:$16 sps:$4 sm:$0xff]   ;;  %v2270_v12 = vld [vmem:[#allocation5 + $0x64] ss:$16 sps:$4 sm:$0xff]   ;;  %v2272_v13 = vld [vmem:[#allocation5 + $0x6c] ss:$16 sps:$4 sm:$0xff]  }
  0x2b   :  { %v2274_v14 = vld [vmem:[#allocation5 + $0x60] ss:$16 sps:$4 sm:$0xff]   ;;  %v2275_v15 = vld [vmem:[#allocation5 + $0x68] ss:$16 sps:$4 sm:$0xff]   ;;  %v2276_v16 = vld [vmem:[#allocation5 + $0x84] ss:$16 sps:$4 sm:$0xff]  }
  0x2c   :  { %1618 = vmatpush1.bf16.msra.mxu0 %v2262_v6  ;;  %1782 = vmatpush1.bf16.msra.mxu1 %v2263_v7  ;;  %v2278_v17 = vld [vmem:[#allocation5 + $0x8c] ss:$16 sps:$4 sm:$0xff]   ;;  %v2280_v18 = vld [vmem:[#allocation5 + $0x80] ss:$16 sps:$4 sm:$0xff]   ;;  %v2281_v19 = vld [vmem:[#allocation5 + $0x88] ss:$16 sps:$4 sm:$0xff]  }
  0x2d   :  { %1619 = vmatprep.subr.bf16.mxu0 %v2264_v8  ;;  %1783 = vmatprep.subr.bf16.mxu1 %v2266_v9  ;;  %v2282_v20 = vld [vmem:[#allocation5 + $0xa4] ss:$16 sps:$4 sm:$0xff]   ;;  %v2284_v21 = vld [vmem:[#allocation5 + $0xac] ss:$16 sps:$4 sm:$0xff]   ;;  %v2286_v22 = vld [vmem:[#allocation5 + $0xa0] ss:$16 sps:$4 sm:$0xff]  }
  0x2e   :  { %v2287_v23 = vld [vmem:[#allocation5 + $0xa8] ss:$16 sps:$4 sm:$0xff]   ;;  %v2288_v24 = vld [vmem:[#allocation5 + $0xc4] ss:$16 sps:$4 sm:$0xff]   ;;  %v2290_v25 = vld [vmem:[#allocation5 + $0xcc] ss:$16 sps:$4 sm:$0xff]  }
  0x2f   :  { %v2292_v26 = vld [vmem:[#allocation5 + $0xc0] ss:$16 sps:$4 sm:$0xff]   ;;  %v2293_v27 = vld [vmem:[#allocation5 + $0xc8] ss:$16 sps:$4 sm:$0xff]   ;;  %v2294_v28 = vld [vmem:[#allocation5 + $0xe4] ss:$16 sps:$4 sm:$0xff]  }
  0x30   :  { %1620 = vmatpush1.bf16.msra.mxu0 %v2268_v10  ;;  %1784 = vmatpush1.bf16.msra.mxu1 %v2269_v11  ;;  %v2296_v29 = vld [vmem:[#allocation5 + $0xec] ss:$16 sps:$4 sm:$0xff]   ;;  %v2298_v30 = vld [vmem:[#allocation5 + $0xe0] ss:$16 sps:$4 sm:$0xff]   ;;  %v2299_v31 = vld [vmem:[#allocation5 + $0xe8] ss:$16 sps:$4 sm:$0xff]  }
  0x31   :  { %1621 = vmatprep.subr.bf16.mxu0 %v2270_v12  ;;  %1785 = vmatprep.subr.bf16.mxu1 %v2272_v13  ;;  %v2300_v32 = vld [vmem:[#allocation5 + $0x104] ss:$16 sps:$4 sm:$0xff]   ;;  %v2302_v33 = vld [vmem:[#allocation5 + $0x10c] ss:$16 sps:$4 sm:$0xff]   ;;  %v2304_v34 = vld [vmem:[#allocation5 + $0x100] ss:$16 sps:$4 sm:$0xff]  }
  0x32   :  { %v2305_v35 = vld [vmem:[#allocation5 + $0x108] ss:$16 sps:$4 sm:$0xff]   ;;  %v2306_v36 = vld [vmem:[#allocation5 + $0x124] ss:$16 sps:$4 sm:$0xff]   ;;  %v2308_v37 = vld [vmem:[#allocation5 + $0x12c] ss:$16 sps:$4 sm:$0xff]  }
  0x33   :  { %v2310_v38 = vld [vmem:[#allocation5 + $0x120] ss:$16 sps:$4 sm:$0xff]   ;;  %v2311_v39 = vld [vmem:[#allocation5 + $0x128] ss:$16 sps:$4 sm:$0xff]   ;;  %v2312_v40 = vld [vmem:[#allocation5 + $0x144] ss:$16 sps:$4 sm:$0xff]  }
  0x34   :  { %1622 = vmatpush1.bf16.msra.mxu0 %v2274_v14  ;;  %1786 = vmatpush1.bf16.msra.mxu1 %v2275_v15  ;;  %v2314_v41 = vld [vmem:[#allocation5 + $0x14c] ss:$16 sps:$4 sm:$0xff]   ;;  %v2316_v42 = vld [vmem:[#allocation5 + $0x140] ss:$16 sps:$4 sm:$0xff]   ;;  %v2317_v43 = vld [vmem:[#allocation5 + $0x148] ss:$16 sps:$4 sm:$0xff]  }
  0x35   :  { %1623 = vmatprep.subr.bf16.mxu0 %v2276_v16  ;;  %1787 = vmatprep.subr.bf16.mxu1 %v2278_v17  ;;  %v2318_v44 = vld [vmem:[#allocation5 + $0x164] ss:$16 sps:$4 sm:$0xff]   ;;  %v2320_v45 = vld [vmem:[#allocation5 + $0x16c] ss:$16 sps:$4 sm:$0xff]   ;;  %v2322_v47 = vld [vmem:[#allocation5 + $0x160] ss:$16 sps:$4 sm:$0xff]  }
  0x36   :  { %v42_v46 = vld [vmem:[#allocation2 + $0x8] sm:$0xff]  ;;  %v2324_v50 = vld [vmem:[#allocation5 + $0x184] ss:$16 sps:$4 sm:$0xff]   ;;  %v2328_v52 = vld [vmem:[#allocation5 + $0x180] ss:$16 sps:$4 sm:$0xff]   ;;  %s2712_s11 = smov [#allocation7]  }
  0x37   :  { %v50_v48 = vpack.c.bf16 %v42_v46, %v42_v46  ;;  %v2323_v49 = vld [vmem:[#allocation5 + $0x168] ss:$16 sps:$4 sm:$0xff]   ;;  %v2326_v51 = vld [vmem:[#allocation5 + $0x18c] ss:$16 sps:$4 sm:$0xff]   ;;  %v2330_v54 = vld [vmem:[#allocation5 + $0x1a4] ss:$16 sps:$4 sm:$0xff]  }
  0x38   :  { %1624 = vmatpush1.bf16.msra.mxu0 %v2280_v18  ;;  %1788 = vmatpush1.bf16.msra.mxu1 %v2281_v19  ;;  %v2329_v53 = vld [vmem:[#allocation5 + $0x188] ss:$16 sps:$4 sm:$0xff]   ;;  %v2332_v55 = vld [vmem:[#allocation5 + $0x1ac] ss:$16 sps:$4 sm:$0xff]   ;;  %v2334_v56 = vld [vmem:[#allocation5 + $0x1a0] ss:$16 sps:$4 sm:$0xff]  }
  0x39   :  { %1625 = vmatprep.subr.bf16.mxu0 %v2282_v20  ;;  %1789 = vmatprep.subr.bf16.mxu1 %v2284_v21  ;;  %v2335_v57 = vld [vmem:[#allocation5 + $0x1a8] ss:$16 sps:$4 sm:$0xff]   ;;  %v2336_v58 = vld [vmem:[#allocation5 + $0x1c4] ss:$16 sps:$4 sm:$0xff]   ;;  %v2338_v59 = vld [vmem:[#allocation5 + $0x1cc] ss:$16 sps:$4 sm:$0xff]  }
  0x3a   :  { %1647 = vmatprep.mubr.bf16.mxu0 %v50_v48  ;;  %1811 = vmatprep.mubr.bf16.mxu1 %v50_v48  ;;  %v2340_v60 = vld [vmem:[#allocation5 + $0x1c0] ss:$16 sps:$4 sm:$0xff]   ;;  %v2341_v61 = vld [vmem:[#allocation5 + $0x1c8] ss:$16 sps:$4 sm:$0xff]   ;;  %v2342_v62 = vld [vmem:[#allocation5 + $0x1e4] ss:$16 sps:$4 sm:$0xff]  }
  0x3b   :  { %v2344_v63 = vld [vmem:[#allocation5 + $0x1ec] ss:$16 sps:$4 sm:$0xff]   ;;  %v2346_v0 = vld [vmem:[#allocation5 + $0x1e0] ss:$16 sps:$4 sm:$0xff]   ;;  %v2347_v1 = vld [vmem:[#allocation5 + $0x1e8] ss:$16 sps:$4 sm:$0xff]  }
  0x3c   :  { %1626 = vmatpush1.bf16.msra.mxu0 %v2286_v22  ;;  %1790 = vmatpush1.bf16.msra.mxu1 %v2287_v23  ;;  %v41_v2 = vld [vmem:[#allocation2] sm:$0xff]  ;;  %v2353_v4 = vld [vmem:[#allocation5 + $0x20c] ss:$16 sps:$4 sm:$0xff]   ;;  %v2351_v7 = vld [vmem:[#allocation5 + $0x208] ss:$16 sps:$4 sm:$0xff]   ;;  %s1953_s12 = sshll.u32 %s2712_s11, 4  ;;  %s1954_s12 = int_to_ptr.vmem [resolvable:$true] %s1953_s12 }
  0x3d   :  { %1627 = vmatprep.subr.bf16.mxu0 %v2288_v24  ;;  %1791 = vmatprep.subr.bf16.mxu1 %v2290_v25  ;;  %v2350_v3 = vld [vmem:[#allocation5 + $0x204] ss:$16 sps:$4 sm:$0xff]   ;;  %v49_v5 = vpack.c.bf16 %v41_v2, %v41_v2  ;;  %v2348_v6 = vld [vmem:[#allocation5 + $0x200] ss:$16 sps:$4 sm:$0xff]   ;;  %v2359_v9 = vld [vmem:[#allocation5 + $0x22c] ss:$16 sps:$4 sm:$0xff]   ;;  %p2685_p3 = scmp.lt.s32.totalorder %s1954_s12, %s1954_s12 }
  0x3e   :  { %v2356_v8 = vld [vmem:[#allocation5 + $0x224] ss:$16 sps:$4 sm:$0xff]   ;;  %v2354_v10 = vld [vmem:[#allocation5 + $0x220] ss:$16 sps:$4 sm:$0xff]   ;;  %v2357_v11 = vld [vmem:[#allocation5 + $0x228] ss:$16 sps:$4 sm:$0xff]  }
  0x3f   :  { %v2362_v12 = vld [vmem:[#allocation5 + $0x244] ss:$16 sps:$4 sm:$0xff]   ;;  %v2365_v13 = vld [vmem:[#allocation5 + $0x24c] ss:$16 sps:$4 sm:$0xff]   ;;  %v2360_v14 = vld [vmem:[#allocation5 + $0x240] ss:$16 sps:$4 sm:$0xff]  }
  0x40   :  { %1628 = vmatpush1.bf16.msra.mxu0 %v2292_v26  ;;  %1792 = vmatpush1.bf16.msra.mxu1 %v2293_v27  ;;  %v2363_v15 = vld [vmem:[#allocation5 + $0x248] ss:$16 sps:$4 sm:$0xff]   ;;  %v2368_v16 = vld [vmem:[#allocation5 + $0x264] ss:$16 sps:$4 sm:$0xff]   ;;  %v2371_v17 = vld [vmem:[#allocation5 + $0x26c] ss:$16 sps:$4 sm:$0xff]  }
  0x41   :  { %1629 = vmatprep.subr.bf16.mxu0 %v2294_v28  ;;  %1793 = vmatprep.subr.bf16.mxu1 %v2296_v29  ;;  %v2366_v18 = vld [vmem:[#allocation5 + $0x260] ss:$16 sps:$4 sm:$0xff]   ;;  %v2369_v19 = vld [vmem:[#allocation5 + $0x268] ss:$16 sps:$4 sm:$0xff]   ;;  %v2374_v20 = vld [vmem:[#allocation5 + $0x284] ss:$16 sps:$4 sm:$0xff]  }
  0x42   :  { %v2377_v21 = vld [vmem:[#allocation5 + $0x28c] ss:$16 sps:$4 sm:$0xff]   ;;  %v2372_v22 = vld [vmem:[#allocation5 + $0x280] ss:$16 sps:$4 sm:$0xff]   ;;  %v2375_v23 = vld [vmem:[#allocation5 + $0x288] ss:$16 sps:$4 sm:$0xff]  }
  0x43   :  { %v2380_v24 = vld [vmem:[#allocation5 + $0x2a4] ss:$16 sps:$4 sm:$0xff]   ;;  %v2383_v25 = vld [vmem:[#allocation5 + $0x2ac] ss:$16 sps:$4 sm:$0xff]   ;;  %v2378_v26 = vld [vmem:[#allocation5 + $0x2a0] ss:$16 sps:$4 sm:$0xff]  }
  0x44   :  { %1630 = vmatpush1.bf16.msra.mxu0 %v2298_v30  ;;  %1794 = vmatpush1.bf16.msra.mxu1 %v2299_v31  ;;  %v2381_v27 = vld [vmem:[#allocation5 + $0x2a8] ss:$16 sps:$4 sm:$0xff]   ;;  %v2386_v28 = vld [vmem:[#allocation5 + $0x2c4] ss:$16 sps:$4 sm:$0xff]   ;;  %v2389_v29 = vld [vmem:[#allocation5 + $0x2cc] ss:$16 sps:$4 sm:$0xff]  }
  0x45   :  { %1631 = vmatprep.subr.bf16.mxu0 %v2300_v32  ;;  %1795 = vmatprep.subr.bf16.mxu1 %v2302_v33  ;;  %v44_v30 = vld [vmem:[#allocation2 + $0x18] sm:$0xff]  ;;  %v2384_v31 = vld [vmem:[#allocation5 + $0x2c0] ss:$16 sps:$4 sm:$0xff]   ;;  %v2410_v46 = vld [vmem:[#allocation5 + $0x344] ss:$16 sps:$4 sm:$0xff]  }
  0x46   :  { %v52_v32 = vpack.c.bf16 %v44_v30, %v44_v30  ;;  %v2387_v33 = vld [vmem:[#allocation5 + $0x2c8] ss:$16 sps:$4 sm:$0xff]   ;;  %v2408_v48 = vld [vmem:[#allocation5 + $0x340] ss:$16 sps:$4 sm:$0xff]   ;;  %v2440_v2 = vld [vmem:[#allocation5 + $0x3e4] ss:$16 sps:$4 sm:$0xff]  }
  0x47   :  { %v2476_v30 = vld [vmem:[#allocation5 + $0x4a4] ss:$16 sps:$4 sm:$0xff]  }
  0x48   :  { %1632 = vmatpush1.bf16.msra.mxu0 %v2304_v34  ;;  %1796 = vmatpush1.bf16.msra.mxu1 %v2305_v35  ;;  %v2392_v34 = vld [vmem:[#allocation5 + $0x2e4] ss:$16 sps:$4 sm:$0xff]   ;;  %v2395_v35 = vld [vmem:[#allocation5 + $0x2ec] ss:$16 sps:$4 sm:$0xff]  }
  0x49   :  { %1633 = vmatprep.subr.bf16.mxu0 %v2306_v36  ;;  %1797 = vmatprep.subr.bf16.mxu1 %v2308_v37  ;;  %v2390_v36 = vld [vmem:[#allocation5 + $0x2e0] ss:$16 sps:$4 sm:$0xff]   ;;  %v2393_v37 = vld [vmem:[#allocation5 + $0x2e8] ss:$16 sps:$4 sm:$0xff]  }
  0x4c   :  { %1634 = vmatpush1.bf16.msra.mxu0 %v2310_v38  ;;  %1798 = vmatpush1.bf16.msra.mxu1 %v2311_v39  ;;  %v2398_v38 = vld [vmem:[#allocation5 + $0x304] ss:$16 sps:$4 sm:$0xff]   ;;  %v2401_v39 = vld [vmem:[#allocation5 + $0x30c] ss:$16 sps:$4 sm:$0xff]  }
  0x4d   :  { %1635 = vmatprep.subr.bf16.mxu0 %v2312_v40  ;;  %1799 = vmatprep.subr.bf16.mxu1 %v2314_v41  ;;  %v2396_v40 = vld [vmem:[#allocation5 + $0x300] ss:$16 sps:$4 sm:$0xff]   ;;  %v2399_v41 = vld [vmem:[#allocation5 + $0x308] ss:$16 sps:$4 sm:$0xff]  }
  0x50   :  { %1636 = vmatpush1.bf16.msra.mxu0 %v2316_v42  ;;  %1800 = vmatpush1.bf16.msra.mxu1 %v2317_v43  ;;  %v2404_v42 = vld [vmem:[#allocation5 + $0x324] ss:$16 sps:$4 sm:$0xff]   ;;  %v2407_v43 = vld [vmem:[#allocation5 + $0x32c] ss:$16 sps:$4 sm:$0xff]  }
  0x51   :  { %1637 = vmatprep.subr.bf16.mxu0 %v2318_v44  ;;  %1801 = vmatprep.subr.bf16.mxu1 %v2320_v45  ;;  %v2402_v44 = vld [vmem:[#allocation5 + $0x320] ss:$16 sps:$4 sm:$0xff]   ;;  %v2405_v45 = vld [vmem:[#allocation5 + $0x328] ss:$16 sps:$4 sm:$0xff]  }
  0x54   :  { %1638 = vmatpush1.bf16.msra.mxu0 %v2322_v47  ;;  %1802 = vmatpush1.bf16.msra.mxu1 %v2323_v49  ;;  %v2413_v47 = vld [vmem:[#allocation5 + $0x34c] ss:$16 sps:$4 sm:$0xff]   ;;  %v2411_v49 = vld [vmem:[#allocation5 + $0x348] ss:$16 sps:$4 sm:$0xff]  }
  0x55   :  { %1639 = vmatprep.subr.bf16.mxu0 %v2324_v50  ;;  %1803 = vmatprep.subr.bf16.mxu1 %v2326_v51  ;;  %v2416_v50 = vld [vmem:[#allocation5 + $0x364] ss:$16 sps:$4 sm:$0xff]   ;;  %v2419_v51 = vld [vmem:[#allocation5 + $0x36c] ss:$16 sps:$4 sm:$0xff]  }
  0x58   :  { %1640 = vmatpush1.bf16.msra.mxu0 %v2328_v52  ;;  %1804 = vmatpush1.bf16.msra.mxu1 %v2329_v53  ;;  %v2414_v52 = vld [vmem:[#allocation5 + $0x360] ss:$16 sps:$4 sm:$0xff]   ;;  %v2417_v53 = vld [vmem:[#allocation5 + $0x368] ss:$16 sps:$4 sm:$0xff]  }
  0x59   :  { %1641 = vmatprep.subr.bf16.mxu0 %v2330_v54  ;;  %1805 = vmatprep.subr.bf16.mxu1 %v2332_v55  ;;  %v2422_v54 = vld [vmem:[#allocation5 + $0x384] ss:$16 sps:$4 sm:$0xff]   ;;  %v2425_v55 = vld [vmem:[#allocation5 + $0x38c] ss:$16 sps:$4 sm:$0xff]  }
  0x5c   :  { %1642 = vmatpush1.bf16.msra.mxu0 %v2334_v56  ;;  %1806 = vmatpush1.bf16.msra.mxu1 %v2335_v57  ;;  %v2420_v56 = vld [vmem:[#allocation5 + $0x380] ss:$16 sps:$4 sm:$0xff]   ;;  %v2423_v57 = vld [vmem:[#allocation5 + $0x388] ss:$16 sps:$4 sm:$0xff]  }
  0x5d   :  { %1643 = vmatprep.subr.bf16.mxu0 %v2336_v58  ;;  %1807 = vmatprep.subr.bf16.mxu1 %v2338_v59  ;;  %v2428_v58 = vld [vmem:[#allocation5 + $0x3a4] ss:$16 sps:$4 sm:$0xff]   ;;  %v2431_v59 = vld [vmem:[#allocation5 + $0x3ac] ss:$16 sps:$4 sm:$0xff]  }
  0x60   :  { %1644 = vmatpush1.bf16.msra.mxu0 %v2340_v60  ;;  %1808 = vmatpush1.bf16.msra.mxu1 %v2341_v61  ;;  %v2426_v60 = vld [vmem:[#allocation5 + $0x3a0] ss:$16 sps:$4 sm:$0xff]   ;;  %v2429_v61 = vld [vmem:[#allocation5 + $0x3a8] ss:$16 sps:$4 sm:$0xff]  }
  0x61   :  { %1645 = vmatprep.subr.bf16.mxu0 %v2342_v62  ;;  %1809 = vmatprep.subr.bf16.mxu1 %v2344_v63  ;;  %v2434_v62 = vld [vmem:[#allocation5 + $0x3c4] ss:$16 sps:$4 sm:$0xff]   ;;  %v2437_v63 = vld [vmem:[#allocation5 + $0x3cc] ss:$16 sps:$4 sm:$0xff]  }
  0x64   :  { %1646 = vmatpush1.bf16.msra.mxu0 %v2346_v0  ;;  %1810 = vmatpush1.bf16.msra.mxu1 %v2347_v1  ;;  %v2432_v0 = vld [vmem:[#allocation5 + $0x3c0] ss:$16 sps:$4 sm:$0xff]   ;;  %v2435_v1 = vld [vmem:[#allocation5 + $0x3c8] ss:$16 sps:$4 sm:$0xff]  }
  0x65   :  { %1656 = vmatprep.subr.bf16.mxu0 %v2350_v3  ;;  %1820 = vmatprep.subr.bf16.mxu1 %v2353_v4  ;;  %v2443_v3 = vld [vmem:[#allocation5 + $0x3ec] ss:$16 sps:$4 sm:$0xff]   ;;  %v2438_v4 = vld [vmem:[#allocation5 + $0x3e0] ss:$16 sps:$4 sm:$0xff]  }
  0x67   :  { %1648 = vmatmul.mubr.bf16.vlgmr.msra.gmra.mrb[0].mxu0 %v49_v5  ;;  %1812 = vmatmul.mubr.bf16.vlgmr.msra.gmra.mrb[0].mxu1 %v49_v5  ;;  %v2441_v5 = vld [vmem:[#allocation5 + $0x3e8] ss:$16 sps:$4 sm:$0xff]  }
  0x68   :  { %1657 = vmatpush1.bf16.msra.mxu0 %v2348_v6  ;;  %1821 = vmatpush1.bf16.msra.mxu1 %v2351_v7  ;;  %v2446_v6 = vld [vmem:[#allocation5 + $0x404] ss:$16 sps:$4 sm:$0xff]  }
  0x69   :  { %1658 = vmatprep.subr.bf16.mxu0 %v2356_v8  ;;  %1822 = vmatprep.subr.bf16.mxu1 %v2359_v9  ;;  %v43_v7 = vld [vmem:[#allocation2 + $0x10] sm:$0xff]  ;;  %v2449_v8 = vld [vmem:[#allocation5 + $0x40c] ss:$16 sps:$4 sm:$0xff]  }
  0x6a   :  { %1688 = vmatprep.mubr.bf16.mxu0 %v52_v32  ;;  %1852 = vmatprep.mubr.bf16.mxu1 %v52_v32  ;;  %v2444_v9 = vld [vmem:[#allocation5 + $0x400] ss:$16 sps:$4 sm:$0xff]  }
  0x6b   :  { %v2474_v32 = vld [vmem:[#allocation5 + $0x4a0] ss:$16 sps:$4 sm:$0xff]  }
  0x6c   :  { %1659 = vmatpush1.bf16.msra.mxu0 %v2354_v10  ;;  %1823 = vmatpush1.bf16.msra.mxu1 %v2357_v11  ;;  %v2447_v10 = vld [vmem:[#allocation5 + $0x408] ss:$16 sps:$4 sm:$0xff]   ;;  %v51_v11 = vpack.c.bf16 %v43_v7, %v43_v7  ;;  %v2539_v7 = vld [vmem:[#allocation5 + $0x5ec] ss:$16 sps:$4 sm:$0xff]  }
  0x6d   :  { %1660 = vmatprep.subr.bf16.mxu0 %v2362_v12  ;;  %1824 = vmatprep.subr.bf16.mxu1 %v2365_v13  ;;  %v2452_v12 = vld [vmem:[#allocation5 + $0x424] ss:$16 sps:$4 sm:$0xff]   ;;  %v2455_v13 = vld [vmem:[#allocation5 + $0x42c] ss:$16 sps:$4 sm:$0xff]  }
  0x70   :  { %1661 = vmatpush1.bf16.msra.mxu0 %v2360_v14  ;;  %1825 = vmatpush1.bf16.msra.mxu1 %v2363_v15  ;;  %v46_v14 = vld [vmem:[#allocation2 + $0x28] sm:$0xff] }
  0x71   :  { %1662 = vmatprep.subr.bf16.mxu0 %v2368_v16  ;;  %1826 = vmatprep.subr.bf16.mxu1 %v2371_v17  ;;  %v54_v15 = vpack.c.bf16 %v46_v14, %v46_v14  ;;  %v2450_v16 = vld [vmem:[#allocation5 + $0x420] ss:$16 sps:$4 sm:$0xff]   ;;  %v2453_v17 = vld [vmem:[#allocation5 + $0x428] ss:$16 sps:$4 sm:$0xff]  }
  0x72   :  { %v48_v14 = vld [vmem:[#allocation2 + $0x38] sm:$0xff] }
  0x74   :  { %1663 = vmatpush1.bf16.msra.mxu0 %v2366_v18  ;;  %1827 = vmatpush1.bf16.msra.mxu1 %v2369_v19  ;;  %v2458_v18 = vld [vmem:[#allocation5 + $0x444] ss:$16 sps:$4 sm:$0xff]   ;;  %v2461_v19 = vld [vmem:[#allocation5 + $0x44c] ss:$16 sps:$4 sm:$0xff]  }
  0x75   :  { %1664 = vmatprep.subr.bf16.mxu0 %v2374_v20  ;;  %1828 = vmatprep.subr.bf16.mxu1 %v2377_v21  ;;  %v2456_v20 = vld [vmem:[#allocation5 + $0x440] ss:$16 sps:$4 sm:$0xff]   ;;  %v2459_v21 = vld [vmem:[#allocation5 + $0x448] ss:$16 sps:$4 sm:$0xff]  }
  0x78   :  { %1665 = vmatpush1.bf16.msra.mxu0 %v2372_v22  ;;  %1829 = vmatpush1.bf16.msra.mxu1 %v2375_v23  ;;  %v2464_v22 = vld [vmem:[#allocation5 + $0x464] ss:$16 sps:$4 sm:$0xff]   ;;  %v2467_v23 = vld [vmem:[#allocation5 + $0x46c] ss:$16 sps:$4 sm:$0xff]  }
  0x79   :  { %1666 = vmatprep.subr.bf16.mxu0 %v2380_v24  ;;  %1830 = vmatprep.subr.bf16.mxu1 %v2383_v25  ;;  %v2462_v24 = vld [vmem:[#allocation5 + $0x460] ss:$16 sps:$4 sm:$0xff]   ;;  %v2465_v25 = vld [vmem:[#allocation5 + $0x468] ss:$16 sps:$4 sm:$0xff]  }
  0x7c   :  { %1667 = vmatpush1.bf16.msra.mxu0 %v2378_v26  ;;  %1831 = vmatpush1.bf16.msra.mxu1 %v2381_v27  ;;  %v2470_v26 = vld [vmem:[#allocation5 + $0x484] ss:$16 sps:$4 sm:$0xff]   ;;  %v2473_v27 = vld [vmem:[#allocation5 + $0x48c] ss:$16 sps:$4 sm:$0xff]  }
  0x7d   :  { %1668 = vmatprep.subr.bf16.mxu0 %v2386_v28  ;;  %1832 = vmatprep.subr.bf16.mxu1 %v2389_v29  ;;  %v2468_v28 = vld [vmem:[#allocation5 + $0x480] ss:$16 sps:$4 sm:$0xff]   ;;  %v2471_v29 = vld [vmem:[#allocation5 + $0x488] ss:$16 sps:$4 sm:$0xff]  }
  0x80   :  { %1669 = vmatpush1.bf16.msra.mxu0 %v2384_v31  ;;  %1833 = vmatpush1.bf16.msra.mxu1 %v2387_v33  ;;  %v2479_v31 = vld [vmem:[#allocation5 + $0x4ac] ss:$16 sps:$4 sm:$0xff]   ;;  %v2477_v33 = vld [vmem:[#allocation5 + $0x4a8] ss:$16 sps:$4 sm:$0xff]  }
  0x81   :  { %1670 = vmatprep.subr.bf16.mxu0 %v2392_v34  ;;  %1834 = vmatprep.subr.bf16.mxu1 %v2395_v35  ;;  %v2482_v34 = vld [vmem:[#allocation5 + $0x4c4] ss:$16 sps:$4 sm:$0xff]   ;;  %v2485_v35 = vld [vmem:[#allocation5 + $0x4cc] ss:$16 sps:$4 sm:$0xff]  }
  0x84   :  { %1671 = vmatpush1.bf16.msra.mxu0 %v2390_v36  ;;  %1835 = vmatpush1.bf16.msra.mxu1 %v2393_v37  ;;  %v2480_v36 = vld [vmem:[#allocation5 + $0x4c0] ss:$16 sps:$4 sm:$0xff]   ;;  %v2483_v37 = vld [vmem:[#allocation5 + $0x4c8] ss:$16 sps:$4 sm:$0xff]  }
  0x85   :  { %1672 = vmatprep.subr.bf16.mxu0 %v2398_v38  ;;  %1836 = vmatprep.subr.bf16.mxu1 %v2401_v39  ;;  %v2488_v38 = vld [vmem:[#allocation5 + $0x4e4] ss:$16 sps:$4 sm:$0xff]   ;;  %v2491_v39 = vld [vmem:[#allocation5 + $0x4ec] ss:$16 sps:$4 sm:$0xff]  }
  0x88   :  { %1673 = vmatpush1.bf16.msra.mxu0 %v2396_v40  ;;  %1837 = vmatpush1.bf16.msra.mxu1 %v2399_v41  ;;  %v2486_v40 = vld [vmem:[#allocation5 + $0x4e0] ss:$16 sps:$4 sm:$0xff]   ;;  %v2489_v41 = vld [vmem:[#allocation5 + $0x4e8] ss:$16 sps:$4 sm:$0xff]  }
  0x89   :  { %1674 = vmatprep.subr.bf16.mxu0 %v2404_v42  ;;  %1838 = vmatprep.subr.bf16.mxu1 %v2407_v43  ;;  %v2494_v42 = vld [vmem:[#allocation5 + $0x504] ss:$16 sps:$4 sm:$0xff]   ;;  %v2497_v43 = vld [vmem:[#allocation5 + $0x50c] ss:$16 sps:$4 sm:$0xff]  }
  0x8c   :  { %1675 = vmatpush1.bf16.msra.mxu0 %v2402_v44  ;;  %1839 = vmatpush1.bf16.msra.mxu1 %v2405_v45  ;;  %v2492_v44 = vld [vmem:[#allocation5 + $0x500] ss:$16 sps:$4 sm:$0xff]   ;;  %v2495_v45 = vld [vmem:[#allocation5 + $0x508] ss:$16 sps:$4 sm:$0xff]  }
  0x8d   :  { %1676 = vmatprep.subr.bf16.mxu0 %v2410_v46  ;;  %1840 = vmatprep.subr.bf16.mxu1 %v2413_v47  ;;  %v2500_v46 = vld [vmem:[#allocation5 + $0x524] ss:$16 sps:$4 sm:$0xff]   ;;  %v2503_v47 = vld [vmem:[#allocation5 + $0x52c] ss:$16 sps:$4 sm:$0xff]  }
  0x90   :  { %1677 = vmatpush1.bf16.msra.mxu0 %v2408_v48  ;;  %1841 = vmatpush1.bf16.msra.mxu1 %v2411_v49  ;;  %v2498_v48 = vld [vmem:[#allocation5 + $0x520] ss:$16 sps:$4 sm:$0xff]   ;;  %v2501_v49 = vld [vmem:[#allocation5 + $0x528] ss:$16 sps:$4 sm:$0xff]  }
  0x91   :  { %1678 = vmatprep.subr.bf16.mxu0 %v2416_v50  ;;  %1842 = vmatprep.subr.bf16.mxu1 %v2419_v51  ;;  %v2506_v50 = vld [vmem:[#allocation5 + $0x544] ss:$16 sps:$4 sm:$0xff]   ;;  %v2509_v51 = vld [vmem:[#allocation5 + $0x54c] ss:$16 sps:$4 sm:$0xff]  }
  0x94   :  { %1679 = vmatpush1.bf16.msra.mxu0 %v2414_v52  ;;  %1843 = vmatpush1.bf16.msra.mxu1 %v2417_v53  ;;  %v2504_v52 = vld [vmem:[#allocation5 + $0x540] ss:$16 sps:$4 sm:$0xff]   ;;  %v2507_v53 = vld [vmem:[#allocation5 + $0x548] ss:$16 sps:$4 sm:$0xff]  }
  0x95   :  { %1680 = vmatprep.subr.bf16.mxu0 %v2422_v54  ;;  %1844 = vmatprep.subr.bf16.mxu1 %v2425_v55  ;;  %v2512_v54 = vld [vmem:[#allocation5 + $0x564] ss:$16 sps:$4 sm:$0xff]   ;;  %v2515_v55 = vld [vmem:[#allocation5 + $0x56c] ss:$16 sps:$4 sm:$0xff]  }
  0x98   :  { %1681 = vmatpush1.bf16.msra.mxu0 %v2420_v56  ;;  %1845 = vmatpush1.bf16.msra.mxu1 %v2423_v57  ;;  %v2510_v56 = vld [vmem:[#allocation5 + $0x560] ss:$16 sps:$4 sm:$0xff]   ;;  %v2513_v57 = vld [vmem:[#allocation5 + $0x568] ss:$16 sps:$4 sm:$0xff]  }
  0x99   :  { %1682 = vmatprep.subr.bf16.mxu0 %v2428_v58  ;;  %1846 = vmatprep.subr.bf16.mxu1 %v2431_v59  ;;  %v2518_v58 = vld [vmem:[#allocation5 + $0x584] ss:$16 sps:$4 sm:$0xff]   ;;  %v2521_v59 = vld [vmem:[#allocation5 + $0x58c] ss:$16 sps:$4 sm:$0xff]  }
  0x9c   :  { %1683 = vmatpush1.bf16.msra.mxu0 %v2426_v60  ;;  %1847 = vmatpush1.bf16.msra.mxu1 %v2429_v61  ;;  %v2516_v60 = vld [vmem:[#allocation5 + $0x580] ss:$16 sps:$4 sm:$0xff]   ;;  %v2519_v61 = vld [vmem:[#allocation5 + $0x588] ss:$16 sps:$4 sm:$0xff]  }
  0x9d   :  { %1684 = vmatprep.subr.bf16.mxu0 %v2434_v62  ;;  %1848 = vmatprep.subr.bf16.mxu1 %v2437_v63  ;;  %v2524_v62 = vld [vmem:[#allocation5 + $0x5a4] ss:$16 sps:$4 sm:$0xff]   ;;  %v2527_v63 = vld [vmem:[#allocation5 + $0x5ac] ss:$16 sps:$4 sm:$0xff]  }
  0xa0   :  { %1685 = vmatpush1.bf16.msra.mxu0 %v2432_v0  ;;  %1849 = vmatpush1.bf16.msra.mxu1 %v2435_v1  ;;  %v2522_v0 = vld [vmem:[#allocation5 + $0x5a0] ss:$16 sps:$4 sm:$0xff]   ;;  %v2525_v1 = vld [vmem:[#allocation5 + $0x5a8] ss:$16 sps:$4 sm:$0xff]  }
  0xa1   :  { %1686 = vmatprep.subr.bf16.mxu0 %v2440_v2  ;;  %1850 = vmatprep.subr.bf16.mxu1 %v2443_v3  ;;  %v2530_v2 = vld [vmem:[#allocation5 + $0x5c4] ss:$16 sps:$4 sm:$0xff]   ;;  %v2533_v3 = vld [vmem:[#allocation5 + $0x5cc] ss:$16 sps:$4 sm:$0xff]  }
  0xa4   :  { %1687 = vmatpush1.bf16.msra.mxu0 %v2438_v4  ;;  %1851 = vmatpush1.bf16.msra.mxu1 %v2441_v5  ;;  %v2528_v4 = vld [vmem:[#allocation5 + $0x5c0] ss:$16 sps:$4 sm:$0xff]   ;;  %v2531_v5 = vld [vmem:[#allocation5 + $0x5c8] ss:$16 sps:$4 sm:$0xff]  }
  0xa5   :  { %1697 = vmatprep.subr.bf16.mxu0 %v2446_v6  ;;  %1861 = vmatprep.subr.bf16.mxu1 %v2449_v8  ;;  %v2536_v6 = vld [vmem:[#allocation5 + $0x5e4] ss:$16 sps:$4 sm:$0xff]   ;;  %v2534_v8 = vld [vmem:[#allocation5 + $0x5e0] ss:$16 sps:$4 sm:$0xff]  }
  0xa7   :  { %1689 = vmatmul.mubr.bf16.vlgmr.msra.gmra.mrb[0].mxu0 %v51_v11  ;;  %1853 = vmatmul.mubr.bf16.vlgmr.msra.gmra.mrb[0].mxu1 %v51_v11  ;;  %v2542_v11 = vld [vmem:[#allocation5 + $0x604] ss:$16 sps:$4 sm:$0xff]  }
  0xa8   :  { %1698 = vmatpush1.bf16.msra.mxu0 %v2444_v9  ;;  %1862 = vmatpush1.bf16.msra.mxu1 %v2447_v10  ;;  %v2537_v9 = vld [vmem:[#allocation5 + $0x5e8] ss:$16 sps:$4 sm:$0xff]   ;;  %v45_v10 = vld [vmem:[#allocation2 + $0x20] sm:$0xff] }
  0xa9   :  { %1699 = vmatprep.subr.bf16.mxu0 %v2452_v12  ;;  %1863 = vmatprep.subr.bf16.mxu1 %v2455_v13  ;;  %v2545_v12 = vld [vmem:[#allocation5 + $0x60c] ss:$16 sps:$4 sm:$0xff]   ;;  %v53_v13 = vpack.c.bf16 %v45_v10, %v45_v10  ;;  %v2632_v10 = vld [vmem:[#allocation5 + $0x7e4] ss:$16 sps:$4 sm:$0xff]  }
  0xaa   :  { %1729 = vmatprep.mubr.bf16.mxu0 %v54_v15  ;;  %1893 = vmatprep.mubr.bf16.mxu1 %v54_v15  ;;  %v2540_v15 = vld [vmem:[#allocation5 + $0x600] ss:$16 sps:$4 sm:$0xff]  }
  0xac   :  { %1700 = vmatpush1.bf16.msra.mxu0 %v2450_v16  ;;  %1864 = vmatpush1.bf16.msra.mxu1 %v2453_v17  ;;  %v2543_v16 = vld [vmem:[#allocation5 + $0x608] ss:$16 sps:$4 sm:$0xff]   ;;  %v2548_v17 = vld [vmem:[#allocation5 + $0x624] ss:$16 sps:$4 sm:$0xff]  }
  0xad   :  { %1701 = vmatprep.subr.bf16.mxu0 %v2458_v18  ;;  %1865 = vmatprep.subr.bf16.mxu1 %v2461_v19  ;;  %v2551_v18 = vld [vmem:[#allocation5 + $0x62c] ss:$16 sps:$4 sm:$0xff]   ;;  %v56_v19 = vpack.c.bf16 %v48_v14, %v48_v14  ;;  %v47_v14 = vld [vmem:[#allocation2 + $0x30] sm:$0xff] }
  0xb0   :  { %1702 = vmatpush1.bf16.msra.mxu0 %v2456_v20  ;;  %1866 = vmatpush1.bf16.msra.mxu1 %v2459_v21  ;;  %v2546_v20 = vld [vmem:[#allocation5 + $0x620] ss:$16 sps:$4 sm:$0xff]   ;;  %v2549_v21 = vld [vmem:[#allocation5 + $0x628] ss:$16 sps:$4 sm:$0xff]  }
  0xb1   :  { %1703 = vmatprep.subr.bf16.mxu0 %v2464_v22  ;;  %1867 = vmatprep.subr.bf16.mxu1 %v2467_v23  ;;  %v2554_v22 = vld [vmem:[#allocation5 + $0x644] ss:$16 sps:$4 sm:$0xff]   ;;  %v2557_v23 = vld [vmem:[#allocation5 + $0x64c] ss:$16 sps:$4 sm:$0xff]  }
  0xb4   :  { %1704 = vmatpush1.bf16.msra.mxu0 %v2462_v24  ;;  %1868 = vmatpush1.bf16.msra.mxu1 %v2465_v25  ;;  %v2552_v24 = vld [vmem:[#allocation5 + $0x640] ss:$16 sps:$4 sm:$0xff]   ;;  %v2555_v25 = vld [vmem:[#allocation5 + $0x648] ss:$16 sps:$4 sm:$0xff]  }
  0xb5   :  { %1705 = vmatprep.subr.bf16.mxu0 %v2470_v26  ;;  %1869 = vmatprep.subr.bf16.mxu1 %v2473_v27  ;;  %v2560_v26 = vld [vmem:[#allocation5 + $0x664] ss:$16 sps:$4 sm:$0xff]   ;;  %v2563_v27 = vld [vmem:[#allocation5 + $0x66c] ss:$16 sps:$4 sm:$0xff]  }
  0xb8   :  { %1706 = vmatpush1.bf16.msra.mxu0 %v2468_v28  ;;  %1870 = vmatpush1.bf16.msra.mxu1 %v2471_v29  ;;  %v2558_v28 = vld [vmem:[#allocation5 + $0x660] ss:$16 sps:$4 sm:$0xff]   ;;  %v2561_v29 = vld [vmem:[#allocation5 + $0x668] ss:$16 sps:$4 sm:$0xff]  }
  0xb9   :  { %1707 = vmatprep.subr.bf16.mxu0 %v2476_v30  ;;  %1871 = vmatprep.subr.bf16.mxu1 %v2479_v31  ;;  %v2566_v30 = vld [vmem:[#allocation5 + $0x684] ss:$16 sps:$4 sm:$0xff]   ;;  %v2569_v31 = vld [vmem:[#allocation5 + $0x68c] ss:$16 sps:$4 sm:$0xff]  }
  0xbc   :  { %1708 = vmatpush1.bf16.msra.mxu0 %v2474_v32  ;;  %1872 = vmatpush1.bf16.msra.mxu1 %v2477_v33  ;;  %v2564_v32 = vld [vmem:[#allocation5 + $0x680] ss:$16 sps:$4 sm:$0xff]   ;;  %v2567_v33 = vld [vmem:[#allocation5 + $0x688] ss:$16 sps:$4 sm:$0xff]  }
  0xbd   :  { %1709 = vmatprep.subr.bf16.mxu0 %v2482_v34  ;;  %1873 = vmatprep.subr.bf16.mxu1 %v2485_v35  ;;  %v2572_v34 = vld [vmem:[#allocation5 + $0x6a4] ss:$16 sps:$4 sm:$0xff]   ;;  %v2575_v35 = vld [vmem:[#allocation5 + $0x6ac] ss:$16 sps:$4 sm:$0xff]  }
  0xc0   :  { %1710 = vmatpush1.bf16.msra.mxu0 %v2480_v36  ;;  %1874 = vmatpush1.bf16.msra.mxu1 %v2483_v37  ;;  %v2570_v36 = vld [vmem:[#allocation5 + $0x6a0] ss:$16 sps:$4 sm:$0xff]   ;;  %v2573_v37 = vld [vmem:[#allocation5 + $0x6a8] ss:$16 sps:$4 sm:$0xff]  }
  0xc1   :  { %1711 = vmatprep.subr.bf16.mxu0 %v2488_v38  ;;  %1875 = vmatprep.subr.bf16.mxu1 %v2491_v39  ;;  %v2578_v38 = vld [vmem:[#allocation5 + $0x6c4] ss:$16 sps:$4 sm:$0xff]   ;;  %v2581_v39 = vld [vmem:[#allocation5 + $0x6cc] ss:$16 sps:$4 sm:$0xff]  }
  0xc4   :  { %1712 = vmatpush1.bf16.msra.mxu0 %v2486_v40  ;;  %1876 = vmatpush1.bf16.msra.mxu1 %v2489_v41  ;;  %v2576_v40 = vld [vmem:[#allocation5 + $0x6c0] ss:$16 sps:$4 sm:$0xff]   ;;  %v2579_v41 = vld [vmem:[#allocation5 + $0x6c8] ss:$16 sps:$4 sm:$0xff]  }
  0xc5   :  { %1713 = vmatprep.subr.bf16.mxu0 %v2494_v42  ;;  %1877 = vmatprep.subr.bf16.mxu1 %v2497_v43  ;;  %v2584_v42 = vld [vmem:[#allocation5 + $0x6e4] ss:$16 sps:$4 sm:$0xff]   ;;  %v2587_v43 = vld [vmem:[#allocation5 + $0x6ec] ss:$16 sps:$4 sm:$0xff]  }
  0xc8   :  { %1714 = vmatpush1.bf16.msra.mxu0 %v2492_v44  ;;  %1878 = vmatpush1.bf16.msra.mxu1 %v2495_v45  ;;  %v2582_v44 = vld [vmem:[#allocation5 + $0x6e0] ss:$16 sps:$4 sm:$0xff]   ;;  %v2585_v45 = vld [vmem:[#allocation5 + $0x6e8] ss:$16 sps:$4 sm:$0xff]  }
  0xc9   :  { %1715 = vmatprep.subr.bf16.mxu0 %v2500_v46  ;;  %1879 = vmatprep.subr.bf16.mxu1 %v2503_v47  ;;  %v2590_v46 = vld [vmem:[#allocation5 + $0x704] ss:$16 sps:$4 sm:$0xff]   ;;  %v2593_v47 = vld [vmem:[#allocation5 + $0x70c] ss:$16 sps:$4 sm:$0xff]  }
  0xcc   :  { %1716 = vmatpush1.bf16.msra.mxu0 %v2498_v48  ;;  %1880 = vmatpush1.bf16.msra.mxu1 %v2501_v49  ;;  %v2588_v48 = vld [vmem:[#allocation5 + $0x700] ss:$16 sps:$4 sm:$0xff]   ;;  %v2591_v49 = vld [vmem:[#allocation5 + $0x708] ss:$16 sps:$4 sm:$0xff]  }
  0xcd   :  { %1717 = vmatprep.subr.bf16.mxu0 %v2506_v50  ;;  %1881 = vmatprep.subr.bf16.mxu1 %v2509_v51  ;;  %v2596_v50 = vld [vmem:[#allocation5 + $0x724] ss:$16 sps:$4 sm:$0xff]   ;;  %v2599_v51 = vld [vmem:[#allocation5 + $0x72c] ss:$16 sps:$4 sm:$0xff]  }
  0xd0   :  { %1718 = vmatpush1.bf16.msra.mxu0 %v2504_v52  ;;  %1882 = vmatpush1.bf16.msra.mxu1 %v2507_v53  ;;  %v2594_v52 = vld [vmem:[#allocation5 + $0x720] ss:$16 sps:$4 sm:$0xff]   ;;  %v2597_v53 = vld [vmem:[#allocation5 + $0x728] ss:$16 sps:$4 sm:$0xff]  }
  0xd1   :  { %1719 = vmatprep.subr.bf16.mxu0 %v2512_v54  ;;  %1883 = vmatprep.subr.bf16.mxu1 %v2515_v55  ;;  %v2602_v54 = vld [vmem:[#allocation5 + $0x744] ss:$16 sps:$4 sm:$0xff]   ;;  %v2605_v55 = vld [vmem:[#allocation5 + $0x74c] ss:$16 sps:$4 sm:$0xff]  }
  0xd4   :  { %1720 = vmatpush1.bf16.msra.mxu0 %v2510_v56  ;;  %1884 = vmatpush1.bf16.msra.mxu1 %v2513_v57  ;;  %v2600_v56 = vld [vmem:[#allocation5 + $0x740] ss:$16 sps:$4 sm:$0xff]   ;;  %v2603_v57 = vld [vmem:[#allocation5 + $0x748] ss:$16 sps:$4 sm:$0xff]  }
  0xd5   :  { %1721 = vmatprep.subr.bf16.mxu0 %v2518_v58  ;;  %1885 = vmatprep.subr.bf16.mxu1 %v2521_v59  ;;  %v2608_v58 = vld [vmem:[#allocation5 + $0x764] ss:$16 sps:$4 sm:$0xff]   ;;  %v2611_v59 = vld [vmem:[#allocation5 + $0x76c] ss:$16 sps:$4 sm:$0xff]  }
  0xd8   :  { %1722 = vmatpush1.bf16.msra.mxu0 %v2516_v60  ;;  %1886 = vmatpush1.bf16.msra.mxu1 %v2519_v61  ;;  %v2606_v60 = vld [vmem:[#allocation5 + $0x760] ss:$16 sps:$4 sm:$0xff]   ;;  %v2609_v61 = vld [vmem:[#allocation5 + $0x768] ss:$16 sps:$4 sm:$0xff]  }
  0xd9   :  { %1723 = vmatprep.subr.bf16.mxu0 %v2524_v62  ;;  %1887 = vmatprep.subr.bf16.mxu1 %v2527_v63  ;;  %v2614_v62 = vld [vmem:[#allocation5 + $0x784] ss:$16 sps:$4 sm:$0xff]   ;;  %v2617_v63 = vld [vmem:[#allocation5 + $0x78c] ss:$16 sps:$4 sm:$0xff]  }
  0xdc   :  { %1724 = vmatpush1.bf16.msra.mxu0 %v2522_v0  ;;  %1888 = vmatpush1.bf16.msra.mxu1 %v2525_v1  ;;  %v2612_v0 = vld [vmem:[#allocation5 + $0x780] ss:$16 sps:$4 sm:$0xff]   ;;  %v2615_v1 = vld [vmem:[#allocation5 + $0x788] ss:$16 sps:$4 sm:$0xff]  }
  0xdd   :  { %1725 = vmatprep.subr.bf16.mxu0 %v2530_v2  ;;  %1889 = vmatprep.subr.bf16.mxu1 %v2533_v3  ;;  %v2620_v2 = vld [vmem:[#allocation5 + $0x7a4] ss:$16 sps:$4 sm:$0xff]   ;;  %v2623_v3 = vld [vmem:[#allocation5 + $0x7ac] ss:$16 sps:$4 sm:$0xff]  }
  0xe0   :  { %1726 = vmatpush1.bf16.msra.mxu0 %v2528_v4  ;;  %1890 = vmatpush1.bf16.msra.mxu1 %v2531_v5  ;;  %v2618_v4 = vld [vmem:[#allocation5 + $0x7a0] ss:$16 sps:$4 sm:$0xff]   ;;  %v2621_v5 = vld [vmem:[#allocation5 + $0x7a8] ss:$16 sps:$4 sm:$0xff]  }
  0xe1   :  { %1727 = vmatprep.subr.bf16.mxu0 %v2536_v6  ;;  %1891 = vmatprep.subr.bf16.mxu1 %v2539_v7  ;;  %v2626_v6 = vld [vmem:[#allocation5 + $0x7c4] ss:$16 sps:$4 sm:$0xff]   ;;  %v2629_v7 = vld [vmem:[#allocation5 + $0x7cc] ss:$16 sps:$4 sm:$0xff]  }
  0xe4   :  { %1728 = vmatpush1.bf16.msra.mxu0 %v2534_v8  ;;  %1892 = vmatpush1.bf16.msra.mxu1 %v2537_v9  ;;  %v2624_v8 = vld [vmem:[#allocation5 + $0x7c0] ss:$16 sps:$4 sm:$0xff]   ;;  %v2627_v9 = vld [vmem:[#allocation5 + $0x7c8] ss:$16 sps:$4 sm:$0xff]  }
  0xe5   :  { %1738 = vmatprep.subr.bf16.mxu0 %v2542_v11  ;;  %1902 = vmatprep.subr.bf16.mxu1 %v2545_v12  ;;  %v2635_v11 = vld [vmem:[#allocation5 + $0x7ec] ss:$16 sps:$4 sm:$0xff]   ;;  %v2630_v12 = vld [vmem:[#allocation5 + $0x7e0] ss:$16 sps:$4 sm:$0xff]  }
  0xe7   :  { %1730 = vmatmul.mubr.bf16.vlgmr.msra.gmra.mrb[0].mxu0 %v53_v13  ;;  %1894 = vmatmul.mubr.bf16.vlgmr.msra.gmra.mrb[0].mxu1 %v53_v13  ;;  %v2633_v13 = vld [vmem:[#allocation5 + $0x7e8] ss:$16 sps:$4 sm:$0xff]  }
  0xe8   :  { %1739 = vmatpush1.bf16.msra.mxu0 %v2540_v15  ;;  %1903 = vmatpush1.bf16.msra.mxu1 %v2543_v16  ;;  %v55_v15 = vpack.c.bf16 %v47_v14, %v47_v14  ;;  %v315_v16 = vlaneseq }
  0xe9   :  { %1740 = vmatprep.subr.bf16.mxu0 %v2548_v17  ;;  %1904 = vmatprep.subr.bf16.mxu1 %v2551_v18 }
  0xea   :  { %1770 = vmatprep.mubr.bf16.mxu0 %v56_v19  ;;  %1934 = vmatprep.mubr.bf16.mxu1 %v56_v19  ;;  %v316_v17 = vshrl.u32 %v315_v16, 7 }
  0xec   :  { %1741 = vmatpush1.bf16.msra.mxu0 %v2546_v20  ;;  %1905 = vmatpush1.bf16.msra.mxu1 %v2549_v21  ;;  %v317_v18 = vsub.s32 0, %v316_v17  ;;  %v325_v19 = vsub.s32 2, %v316_v17  ;;  %v313_v20 = vld [vmem:[%s2781_s2] sm:$0xf]  ;;  %v321_v21 = vsub.s32 1, %v316_v17  ;;  %s2680_s2 = scalar_lea.vmem %s1954_s12, 512 }
  0xed   :  { %1742 = vmatprep.subr.bf16.mxu0 %v2554_v22  ;;  %1906 = vmatprep.subr.bf16.mxu1 %v2557_v23  ;;  %v329_v22 = vsub.s32 3, %v316_v17  ;;  %p2681_p2 = scmp.ne.s32.totalorder %s1954_s12, %s2680_s2  ;;  %p2686_p4 = scmp.lt.s32.totalorder %s2680_s2, %s2680_s2 }
  0xee   :  { %v318_v23 = vrot.slane %v313_v20, %v317_v18 }
  0xef   :  { %p2687_p5 = por %p2686_p4, %p2685_p3 }
  0xf0   :  { %1743 = vmatpush1.bf16.msra.mxu0 %v2552_v24  ;;  %1907 = vmatpush1.bf16.msra.mxu1 %v2555_v25  ;;  %v326_v24 = vrot.slane %v313_v20, %v325_v19  ;;  %v322_v25 = vrot.slane %v313_v20, %v321_v21 }
  0xf1   :  { %1744 = vmatprep.subr.bf16.mxu0 %v2560_v26  ;;  %1908 = vmatprep.subr.bf16.mxu1 %v2563_v27  ;;  %v330_v26 = vrot.slane %v313_v20, %v329_v22  ;;  %p2688_p6 = pnand %p2687_p5, %p2681_p2 }
  0xf4   :  { %1745 = vmatpush1.bf16.msra.mxu0 %v2558_v28  ;;  %1909 = vmatpush1.bf16.msra.mxu1 %v2561_v29 }
  0xf5   :  { %1746 = vmatprep.subr.bf16.mxu0 %v2566_v30  ;;  %1910 = vmatprep.subr.bf16.mxu1 %v2569_v31 }
  0xf8   :  { %1747 = vmatpush1.bf16.msra.mxu0 %v2564_v32  ;;  %1911 = vmatpush1.bf16.msra.mxu1 %v2567_v33 }
  0xf9   :  { %1748 = vmatprep.subr.bf16.mxu0 %v2572_v34  ;;  %1912 = vmatprep.subr.bf16.mxu1 %v2575_v35 }
  0xfc   :  { %1749 = vmatpush1.bf16.msra.mxu0 %v2570_v36  ;;  %1913 = vmatpush1.bf16.msra.mxu1 %v2573_v37 }
  0xfd   :  { %1750 = vmatprep.subr.bf16.mxu0 %v2578_v38  ;;  %1914 = vmatprep.subr.bf16.mxu1 %v2581_v39 }
 0x100   :  { %1751 = vmatpush1.bf16.msra.mxu0 %v2576_v40  ;;  %1915 = vmatpush1.bf16.msra.mxu1 %v2579_v41 }
 0x101   :  { %1752 = vmatprep.subr.bf16.mxu0 %v2584_v42  ;;  %1916 = vmatprep.subr.bf16.mxu1 %v2587_v43 }
 0x104   :  { %1753 = vmatpush1.bf16.msra.mxu0 %v2582_v44  ;;  %1917 = vmatpush1.bf16.msra.mxu1 %v2585_v45 }
 0x105   :  { %1754 = vmatprep.subr.bf16.mxu0 %v2590_v46  ;;  %1918 = vmatprep.subr.bf16.mxu1 %v2593_v47 }
 0x108   :  { %1755 = vmatpush1.bf16.msra.mxu0 %v2588_v48  ;;  %1919 = vmatpush1.bf16.msra.mxu1 %v2591_v49 }
 0x109   :  { %1756 = vmatprep.subr.bf16.mxu0 %v2596_v50  ;;  %1920 = vmatprep.subr.bf16.mxu1 %v2599_v51 }
 0x10c   :  { %1757 = vmatpush1.bf16.msra.mxu0 %v2594_v52  ;;  %1921 = vmatpush1.bf16.msra.mxu1 %v2597_v53 }
 0x10d   :  { %1758 = vmatprep.subr.bf16.mxu0 %v2602_v54  ;;  %1922 = vmatprep.subr.bf16.mxu1 %v2605_v55 }
 0x110   :  { %1759 = vmatpush1.bf16.msra.mxu0 %v2600_v56  ;;  %1923 = vmatpush1.bf16.msra.mxu1 %v2603_v57 }
 0x111   :  { %1760 = vmatprep.subr.bf16.mxu0 %v2608_v58  ;;  %1924 = vmatprep.subr.bf16.mxu1 %v2611_v59 }
 0x114   :  { %1761 = vmatpush1.bf16.msra.mxu0 %v2606_v60  ;;  %1925 = vmatpush1.bf16.msra.mxu1 %v2609_v61 }
 0x115   :  { %1762 = vmatprep.subr.bf16.mxu0 %v2614_v62  ;;  %1926 = vmatprep.subr.bf16.mxu1 %v2617_v63 }
 0x118   :  { %1763 = vmatpush1.bf16.msra.mxu0 %v2612_v0  ;;  %1927 = vmatpush1.bf16.msra.mxu1 %v2615_v1 }
 0x119   :  { %1764 = vmatprep.subr.bf16.mxu0 %v2620_v2  ;;  %1928 = vmatprep.subr.bf16.mxu1 %v2623_v3 }
 0x11c   :  { %1765 = vmatpush1.bf16.msra.mxu0 %v2618_v4  ;;  %1929 = vmatpush1.bf16.msra.mxu1 %v2621_v5 }
 0x11d   :  { %1766 = vmatprep.subr.bf16.mxu0 %v2626_v6  ;;  %1930 = vmatprep.subr.bf16.mxu1 %v2629_v7 }
 0x120   :  { %1767 = vmatpush1.bf16.msra.mxu0 %v2624_v8  ;;  %1931 = vmatpush1.bf16.msra.mxu1 %v2627_v9 }
 0x121   :  { %1768 = vmatprep.subr.bf16.mxu0 %v2632_v10  ;;  %1932 = vmatprep.subr.bf16.mxu1 %v2635_v11 }
 0x124   :  { %1769 = vmatpush1.bf16.msra.mxu0 %v2630_v12  ;;  %1933 = vmatpush1.bf16.msra.mxu1 %v2633_v13 }
 0x127   :  { %1771 = vmatmul.mubr.bf16.vlgmr.msra.gmra.mrb[0].mxu0 %v55_v15  ;;  %1935 = vmatmul.mubr.bf16.vlgmr.msra.gmra.mrb[0].mxu1 %v55_v15 }
 0x1fa   :  { %v1772_v27 = vpop.f32.mrb[0].mxu0  ;;  %v1936_v28 = vpop.f32.mrb[0].mxu1 }
 0x1fb   :  { %v2219_v29 = vadd.f32 %v1772_v27, %v318_v23  ;;  %v2221_v30 = vadd.f32 %v1936_v28, %v326_v24  ;;  %v1774_v31 = vpop.f32.mrb[1].mxu0  ;;  %v1938_v32 = vpop.f32.mrb[1].mxu1 }
 0x1fc   :  { %v2220_v33 = vadd.f32 %v1774_v31, %v322_v25  ;;  %v2222_v34 = vadd.f32 %v1938_v32, %v330_v26  ;;  %v1776_v35 = vpop.f32.mrb[2].mxu0  ;;  %v1940_v36 = vpop.f32.mrb[2].mxu1 }
 0x1fd   :  { %1943 = vst [vmem:[#allocation7] sm:$0xff] %v2219_v29  ;;  %1945 = vst [vmem:[#allocation7 + $0x10] sm:$0xff] %v2221_v30  ;;  %v1777_v37 = vpop.f32.mrb[3].mxu0  ;;  %v1941_v38 = vpop.f32.mrb[3].mxu1 }
 0x1fe   :  { %1944 = vst [vmem:[#allocation7 + $0x8] sm:$0xff] %v2220_v33  ;;  %1946 = vst [vmem:[#allocation7 + $0x18] sm:$0xff] %v2222_v34 }
 0x1ff   :  { %2691 = shalt.err (!%p2688_p6)
}
 0x200   :  { %s2692_s15 = scalar_lea.hbm %s2782_s3, 512 }
 0x201   :  { %p2693_p7 = scmp.ne.s32.totalorder %s2782_s3, %s2692_s15  ;;  %p2696_p8 = scmp.lt.u32.totalorder %s2692_s15, %s2782_s3 }
 0x203   :  { %p2698_p9 = pnand %p2696_p8, %p2693_p7 }
 0x205   :  { %2701 = shalt.err (!%p2698_p9)
}
 0x206   :  { %1956 = dma.vmem_to_hbm [thread:$0]  %s1954_s12, 512, %s2782_s3, [#allocation4]  }
 0x207   :  { %2706 = dma.done.wait [#allocation4], 512  }
 0x208   :  { %2707 = vsyncadd [#allocation4], 4294966784 }
 0x209   :  { %1960 = vsyncpa [#allocation3], 1 }
 0x20a   :  { %1961 = vsyncpa [#allocation6], 1 }
 0x20b   :  { %1962 = vsyncpa [#allocation4], 1 }

</bundles_post_ra>
